<compile_context>
chip_gen: v6e
topology: v6e:2x2x1
jax: 0.10.0
libtpu: 0.0.40
codegen_flags: <defaults>
</compile_context>

<pallas_src>
import jax
import jax.numpy as jnp
from jax.experimental import pallas as pl
from jax.experimental.pallas import tpu as pltpu

BN_EPS = 1e-5
HIDDEN = 128
OUT_PAD = 128           # lane-dense width for the final Linear(128, 1)


def _round_up(x, m):
    return (x + m - 1) // m * m


# ---------------------------------------------------------------------------
# Fused single-kernel path (whole batch resident in VMEM).
# ---------------------------------------------------------------------------
def _make_fused_kernel(batch, need_mask):
    inv_b = 1.0 / float(batch)

    def kernel(x_ref, w1_ref, b1_ref, g1_ref, beta1_ref,
               w2_ref, b2_ref, g2_ref, beta2_ref,
               w3_ref, b3_ref, o_ref):
        rows = x_ref.shape[0]
        if need_mask:
            row = jax.lax.broadcasted_iota(jnp.int32, (rows, 1), 0)
            mask = row < batch
        else:
            mask = None

        def batchnorm(h, g, beta):
            # exact (two-pass) biased batch statistics, f32
            hm = jnp.where(mask, h, 0.0) if mask is not None else h
            mean = jnp.sum(hm, axis=0, keepdims=True) * inv_b
            d = h - mean
            if mask is not None:
                d = jnp.where(mask, d, 0.0)
            var = jnp.sum(d * d, axis=0, keepdims=True) * inv_b
            scale = g * jax.lax.rsqrt(var + BN_EPS)
            shift = beta - mean * scale
            return h * scale + shift

        # Linear(F, H) + ReLU
        h1 = jnp.dot(x_ref[...].astype(jnp.bfloat16), w1_ref[...],
                     preferred_element_type=jnp.float32)
        h1 = jnp.maximum(h1 + b1_ref[...], 0.0)
        h1n = batchnorm(h1, g1_ref[...], beta1_ref[...])

        # Linear(H, H) + ReLU
        h2 = jnp.dot(h1n.astype(jnp.bfloat16), w2_ref[...],
                     preferred_element_type=jnp.float32)
        h2 = jnp.maximum(h2 + b2_ref[...], 0.0)
        h2n = batchnorm(h2, g2_ref[...], beta2_ref[...])

        # Linear(H, 1), zero-padded to 128 output lanes (unmasked lane-dense vst)
        out = jnp.dot(h2n.astype(jnp.bfloat16), w3_ref[...],
                      preferred_element_type=jnp.float32) + b3_ref[...]
        o_ref[...] = out

    return kernel


def _forward_fused(x, prep, B):
    b_pad = _round_up(B, 8)
    need_mask = b_pad != B
    xb = jnp.pad(x, ((0, b_pad - B), (0, 0))) if need_mask else x

    out_pad = pl.pallas_call(
        _make_fused_kernel(B, need_mask),
        out_shape=jax.ShapeDtypeStruct((b_pad, OUT_PAD), jnp.float32),
    )(xb, prep["w1"], prep["b1"], prep["g1"], prep["beta1"],
      prep["w2"], prep["b2"], prep["g2"], prep["beta2"],
      prep["w3p"], prep["b3p"])
    return out_pad[:B, 0:1]


# ---------------------------------------------------------------------------
# Tiled fallback path (large batches).
# ---------------------------------------------------------------------------
def _row_mask(tile_rows, batch, tile_idx):
    """(tile_rows, 1) mask of rows belonging to the real (unpadded) batch."""
    row = tile_idx * tile_rows + jax.lax.broadcasted_iota(
        jnp.int32, (tile_rows, 1), 0)
    return row < batch


def _partial_stats(h, mask):
    """Per-tile (1, 1, 2H) [sum | sum-of-squares] over the batch axis."""
    hm = jnp.where(mask, h, 0.0) if mask is not None else h
    s = jnp.sum(hm, axis=0, keepdims=True)          # (1, H)
    q = jnp.sum(hm * hm, axis=0, keepdims=True)     # (1, H)
    return jnp.concatenate([s, q], axis=-1)[None]   # (1, 1, 2H) lane-dense


def _make_stage_a(tile_rows, batch, need_mask):
    def kernel(x_ref, w_ref, b_ref, h_ref, stats_ref):
        # Linear(F, H) + ReLU   (bf16 MXU operands, f32 accumulate / VPU math)
        h = jnp.dot(x_ref[...].astype(jnp.bfloat16), w_ref[...],
                    preferred_element_type=jnp.float32)
        h = jnp.maximum(h + b_ref[...], 0.0)
        mask = _row_mask(tile_rows, batch, pl.program_id(0)) if need_mask else None
        stats_ref[...] = _partial_stats(h, mask)
        h_ref[...] = h.astype(h_ref.dtype)
    return kernel


def _make_stage_b(tile_rows, batch, need_mask):
    def kernel(h_ref, w_ref, b_ref, o_ref, stats_ref):
        # BN1 is pre-folded into w/b: just Linear(H, H) + ReLU
        h = jnp.dot(h_ref[...], w_ref[...], preferred_element_type=jnp.float32)
        h = jnp.maximum(h + b_ref[...], 0.0)
        mask = _row_mask(tile_rows, batch, pl.program_id(0)) if need_mask else None
        stats_ref[...] = _partial_stats(h, mask)
        o_ref[...] = h.astype(o_ref.dtype)
    return kernel


def _bn_scale_shift(partial_stats, gamma, beta, batch):
    """Fold per-tile (sum | sumsq) partials into a single BN scale/shift."""
    H = gamma.shape[-1]
    total = jnp.sum(partial_stats, axis=0)            # (1, 2H) f32
    mean = total[:, :H] / batch
    var = jnp.maximum(total[:, H:] / batch - mean * mean, 0.0)
    scale = gamma * jax.lax.rsqrt(var + BN_EPS)
    shift = beta - mean * scale
    return scale, shift


def _forward_tiled(x, prep, B, F, H, tile_rows):
    if B <= tile_rows:
        # guarantee nb == 2 so the parallel grid axis uses both TCs on v7x
        tm = _round_up((B + 1) // 2, 16)
        b_pad = 2 * tm
    else:
        tm = tile_rows
        b_pad = _round_up(B, tm)
    nb = b_pad // tm
    need_mask = b_pad != B
    xb = jnp.pad(x, ((0, b_pad - B), (0, 0))) if need_mask else x

    cparams = pltpu.CompilerParams(dimension_semantics=("parallel",))
    row_spec = pl.BlockSpec((tm, H), lambda i: (i, 0))            # bf16 acts
    vec_spec = pl.BlockSpec((1, H), lambda i: (0, 0))             # bias
    mat_spec = pl.BlockSpec((H, H), lambda i: (0, 0))             # weights
    stats_spec = pl.BlockSpec((1, 1, 2 * H), lambda i: (i, 0, 0))  # partials

    # ---- stage A: Linear(F, H) + ReLU, partial BN1 stats ----
    h1, st1 = pl.pallas_call(
        _make_stage_a(tm, B, need_mask),
        grid=(nb,),
        in_specs=[pl.BlockSpec((tm, F), lambda i: (i, 0)),
                  pl.BlockSpec((F, H), lambda i: (0, 0)),
                  vec_spec],
        out_specs=[row_spec, stats_spec],
        out_shape=(jax.ShapeDtypeStruct((b_pad, H), jnp.bfloat16),
                   jax.ShapeDtypeStruct((nb, 1, 2 * H), jnp.float32)),
        compiler_params=cparams,
    )(xb, prep["w1"], prep["b1"])
    scale1, shift1 = _bn_scale_shift(st1, prep["g1"], prep["beta1"], B)

    # fold BN1 into Linear2:  h1n @ w2 + b2 == h1 @ (scale1.T*w2) + (shift1@w2 + b2)
    w2f = (scale1.reshape(H, 1) * prep["w2_f32"]).astype(jnp.bfloat16)
    b2f = shift1 @ prep["w2_f32"] + prep["b2"]

    # ---- stage B: Linear(H, H) + ReLU, partial BN2 stats ----
    h2, st2 = pl.pallas_call(
        _make_stage_b(tm, B, need_mask),
        grid=(nb,),
        in_specs=[row_spec, mat_spec, vec_spec],
        out_specs=[row_spec, stats_spec],
        out_shape=(jax.ShapeDtypeStruct((b_pad, H), jnp.bfloat16),
                   jax.ShapeDtypeStruct((nb, 1, 2 * H), jnp.float32)),
        compiler_params=cparams,
    )(h1, w2f, b2f)
    scale2, shift2 = _bn_scale_shift(st2, prep["g2"], prep["beta2"], B)

    # fold BN2 into Linear3; the final matvec writes only (B, 1) -- no padded slab
    w3f = (scale2.reshape(H, 1) * prep["w3"]).astype(jnp.bfloat16)
    b3f = shift2 @ prep["w3"] + prep["b3"]
    out = jnp.dot(h2[:B], w3f, preferred_element_type=jnp.float32) + b3f
    return out


# ---------------------------------------------------------------------------
# Public forward + parameter helpers.
# ---------------------------------------------------------------------------
def binary_classification_forward(x, prep, *, tile_rows=1024,
                                  max_fused_rows=2048, force_tiled=False):
    """x: (B, F) float32. prep: output of prepare_params()."""
    B, F = x.shape
    H = HIDDEN
    if (not force_tiled) and B <= max_fused_rows:
        return _forward_fused(x, prep, B)
    return _forward_tiled(x, prep, B, F, H, tile_rows)


def prepare_params(params):
    """One-time weight prep: bf16 casts and 128-lane padding of Linear(128,1)."""
    H = params["w1"].shape[1]
    w3p = jnp.zeros((H, OUT_PAD), jnp.float32).at[:, 0:1].set(params["w3"])
    b3p = jnp.zeros((1, OUT_PAD), jnp.float32).at[:, 0:1].set(params["b3"])
    return dict(
        w1=params["w1"].astype(jnp.bfloat16),
        b1=params["b1"], g1=params["g1"], beta1=params["beta1"],
        w2=params["w2"].astype(jnp.bfloat16), w2_f32=params["w2"],
        b2=params["b2"], g2=params["g2"], beta2=params["beta2"],
        w3=params["w3"], b3=params["b3"],
        w3p=w3p.astype(jnp.bfloat16), b3p=b3p,
    )


def init_params(key, in_features, hidden=HIDDEN):
    """PyTorch nn.Linear default init; BN gamma=1, beta=0. Masters in float32."""
    ks = jax.random.split(key, 6)

    def lin(kw, kb, fan_in, fan_out):
        bound = 1.0 / jnp.sqrt(jnp.float32(fan_in))
        w = jax.random.uniform(kw, (fan_in, fan_out), jnp.float32, -bound, bound)
        b = jax.random.uniform(kb, (1, fan_out), jnp.float32, -bound, bound)
        return w, b

    w1, b1 = lin(ks[0], ks[1], in_features, hidden)
    w2, b2 = lin(ks[2], ks[3], hidden, hidden)
    w3, b3 = lin(ks[4], ks[5], hidden, 1)
    return dict(
        w1=w1, b1=b1,
        g1=jnp.ones((1, hidden), jnp.float32), beta1=jnp.zeros((1, hidden), jnp.float32),
        w2=w2, b2=b2,
        g2=jnp.ones((1, hidden), jnp.float32), beta2=jnp.zeros((1, hidden), jnp.float32),
        w3=w3, b3=b3,
    )


# ---------------------------------------------------------------------------
# References.
# ---------------------------------------------------------------------------
def reference_forward_f32(x, p):
    """Pure-f32 reference with the original module's math (training-mode BN)."""
    def bn(h, g, b):
        m = jnp.mean(h, axis=0, keepdims=True)
        v = jnp.mean((h - m) ** 2, axis=0, keepdims=True)
        return (h - m) / jnp.sqrt(v + BN_EPS) * g + b

    h = jnp.maximum(x @ p["w1"] + p["b1"], 0.0)
    h = bn(h, p["g1"], p["beta1"])
    h = jnp.maximum(h @ p["w2"] + p["b2"], 0.0)
    h = bn(h, p["g2"], p["beta2"])
    return h @ p["w3"] + p["b3"]


def reference_forward_matched_fused(x, p):
    """jnp replica of the fused kernel's numerics: bf16 matmul operands
    (f32 accumulation), f32 activations, exact two-pass batch stats."""
    bf = jnp.bfloat16

    def bn(h, g, beta):
        m = jnp.mean(h, axis=0, keepdims=True)
        v = jnp.mean((h - m) ** 2, axis=0, keepdims=True)
        sc = g * jax.lax.rsqrt(v + BN_EPS)
        return h * sc + (beta - m * sc)

    h1 = jnp.maximum(
        jnp.dot(x.astype(bf), p["w1"].astype(bf),
                preferred_element_type=jnp.float32) + p["b1"], 0.0)
    h1n = bn(h1, p["g1"], p["beta1"])
    h2 = jnp.maximum(
        jnp.dot(h1n.astype(bf), p["w2"].astype(bf),
                preferred_element_type=jnp.float32) + p["b2"], 0.0)
    h2n = bn(h2, p["g2"], p["beta2"])
    return jnp.dot(h2n.astype(bf), p["w3"].astype(bf),
                   preferred_element_type=jnp.float32) + p["b3"]


if __name__ == "__main__":
    key = jax.random.PRNGKey(0)
    k_x, k_p, k_x2 = jax.random.split(key, 3)

    B, F = 8, 16          # batch=8, in_features = len(X_test[0]) = 16 (synthetic)
    x = jax.random.normal(k_x, (B, F), jnp.float32)
    params = init_params(k_p, F)
    prep = prepare_params(params)

    fwd = jax.jit(binary_classification_forward,
                  static_argnames=("tile_rows", "max_fused_rows", "force_tiled"))

    # ---- fused single-kernel path (default for small/medium batches) ----
    out = jax.block_until_ready(fwd(x, prep))
    assert out.shape == (B, 1)
    ref_m = reference_forward_matched_fused(x, params)
    assert jnp.allclose(out, ref_m, atol=1e-3, rtol=1e-3)
    ref_f = reference_forward_f32(x, params)
    assert jnp.allclose(out, ref_f, atol=1e-1, rtol=1e-1)

    # ---- tiled fallback path (exercises masking, BN-fold, nb >= 2 grid) ----
    B2 = 300
    x2 = jax.random.normal(k_x2, (B2, F), jnp.float32)
    out2 = jax.block_until_ready(fwd(x2, prep, force_tiled=True))
    assert out2.shape == (B2, 1)
    ref2 = reference_forward_f32(x2, params)
    assert jnp.allclose(out2, ref2, atol=1e-1, rtol=1e-1)

    print("KERNEL_OK")
</pallas_src>

<mosaic_0001>
module attributes {stable_mosaic.version = 11 : i64} {
  func.func @kernel(%arg0: memref<8x16xf32, #tpu.memory_space<vmem>>, %arg1: memref<16x128xbf16, #tpu.memory_space<vmem>>, %arg2: memref<1x128xf32, #tpu.memory_space<vmem>>, %arg3: memref<1x128xf32, #tpu.memory_space<vmem>>, %arg4: memref<1x128xf32, #tpu.memory_space<vmem>>, %arg5: memref<128x128xbf16, #tpu.memory_space<vmem>>, %arg6: memref<1x128xf32, #tpu.memory_space<vmem>>, %arg7: memref<1x128xf32, #tpu.memory_space<vmem>>, %arg8: memref<1x128xf32, #tpu.memory_space<vmem>>, %arg9: memref<128x128xbf16, #tpu.memory_space<vmem>>, %arg10: memref<1x128xf32, #tpu.memory_space<vmem>>, %arg11: memref<8x128xf32, #tpu.memory_space<vmem>>) attributes {dimension_semantics = [], scalar_prefetch = 0 : i64, scratch_operands = 0 : i64, tpu.core_type = #tpu.core_type<tc>} {
    %c0 = arith.constant 0 : index
    %c0_0 = arith.constant 0 : index
    %0 = vector.load %arg0[%c0, %c0_0] : memref<8x16xf32, #tpu.memory_space<vmem>>, vector<8x16xf32>
    %1 = arith.truncf %0 : vector<8x16xf32> to vector<8x16xbf16>
    %c0_1 = arith.constant 0 : index
    %c0_2 = arith.constant 0 : index
    %2 = vector.load %arg1[%c0_1, %c0_2] : memref<16x128xbf16, #tpu.memory_space<vmem>>, vector<16x128xbf16>
    %cst = arith.constant dense<0.000000e+00> : vector<8x128xf32>
    %3 = tpu.matmul %1, %2, %cst {dimension_numbers = #tpu.dot_dimension_numbers<[1], [0], [0], [1], [0, 0, 1, 1], [], []>} : vector<8x16xbf16>, vector<16x128xbf16>, vector<8x128xf32> -> vector<8x128xf32>
    %c0_3 = arith.constant 0 : index
    %c0_4 = arith.constant 0 : index
    %4 = vector.load %arg2[%c0_3, %c0_4] : memref<1x128xf32, #tpu.memory_space<vmem>>, vector<1x128xf32>
    %5 = vector.broadcast %4 : vector<1x128xf32> to vector<8x128xf32>
    %6 = arith.addf %3, %5 : vector<8x128xf32>
    %cst_5 = arith.constant 0.000000e+00 : f32
    %7 = vector.broadcast %cst_5 : f32 to vector<8x128xf32>
    %8 = arith.maximumf %6, %7 : vector<8x128xf32>
    %c0_6 = arith.constant 0 : index
    %c0_7 = arith.constant 0 : index
    %9 = vector.load %arg3[%c0_6, %c0_7] : memref<1x128xf32, #tpu.memory_space<vmem>>, vector<1x128xf32>
    %c0_8 = arith.constant 0 : index
    %c0_9 = arith.constant 0 : index
    %10 = vector.load %arg4[%c0_8, %c0_9] : memref<1x128xf32, #tpu.memory_space<vmem>>, vector<1x128xf32>
    %cst_10 = arith.constant dense<0.000000e+00> : vector<128xf32>
    %11 = vector.multi_reduction <add>, %8, %cst_10 [0] : vector<8x128xf32> to vector<128xf32>
    %12 = vector.shape_cast %11 : vector<128xf32> to vector<1x128xf32>
    %cst_11 = arith.constant 1.250000e-01 : f32
    %13 = vector.broadcast %cst_11 : f32 to vector<1x128xf32>
    %14 = arith.mulf %12, %13 : vector<1x128xf32>
    %15 = vector.broadcast %14 : vector<1x128xf32> to vector<8x128xf32>
    %16 = arith.subf %8, %15 : vector<8x128xf32>
    %17 = arith.mulf %16, %16 : vector<8x128xf32>
    %cst_12 = arith.constant dense<0.000000e+00> : vector<128xf32>
    %18 = vector.multi_reduction <add>, %17, %cst_12 [0] : vector<8x128xf32> to vector<128xf32>
    %19 = vector.shape_cast %18 : vector<128xf32> to vector<1x128xf32>
    %cst_13 = arith.constant 1.250000e-01 : f32
    %20 = vector.broadcast %cst_13 : f32 to vector<1x128xf32>
    %21 = arith.mulf %19, %20 : vector<1x128xf32>
    %cst_14 = arith.constant 9.99999974E-6 : f32
    %22 = vector.broadcast %cst_14 : f32 to vector<1x128xf32>
    %23 = arith.addf %21, %22 : vector<1x128xf32>
    %24 = math.rsqrt %23 : vector<1x128xf32>
    %25 = arith.mulf %9, %24 : vector<1x128xf32>
    %26 = arith.mulf %14, %25 : vector<1x128xf32>
    %27 = arith.subf %10, %26 : vector<1x128xf32>
    %28 = vector.broadcast %25 : vector<1x128xf32> to vector<8x128xf32>
    %29 = arith.mulf %8, %28 : vector<8x128xf32>
    %30 = vector.broadcast %27 : vector<1x128xf32> to vector<8x128xf32>
    %31 = arith.addf %29, %30 : vector<8x128xf32>
    %32 = arith.truncf %31 : vector<8x128xf32> to vector<8x128xbf16>
    %c0_15 = arith.constant 0 : index
    %c0_16 = arith.constant 0 : index
    %33 = vector.load %arg5[%c0_15, %c0_16] : memref<128x128xbf16, #tpu.memory_space<vmem>>, vector<128x128xbf16>
    %cst_17 = arith.constant dense<0.000000e+00> : vector<8x128xf32>
    %34 = tpu.matmul %32, %33, %cst_17 {dimension_numbers = #tpu.dot_dimension_numbers<[1], [0], [0], [1], [0, 0, 1, 1], [], []>} : vector<8x128xbf16>, vector<128x128xbf16>, vector<8x128xf32> -> vector<8x128xf32>
    %c0_18 = arith.constant 0 : index
    %c0_19 = arith.constant 0 : index
    %35 = vector.load %arg6[%c0_18, %c0_19] : memref<1x128xf32, #tpu.memory_space<vmem>>, vector<1x128xf32>
    %36 = vector.broadcast %35 : vector<1x128xf32> to vector<8x128xf32>
    %37 = arith.addf %34, %36 : vector<8x128xf32>
    %cst_20 = arith.constant 0.000000e+00 : f32
    %38 = vector.broadcast %cst_20 : f32 to vector<8x128xf32>
    %39 = arith.maximumf %37, %38 : vector<8x128xf32>
    %c0_21 = arith.constant 0 : index
    %c0_22 = arith.constant 0 : index
    %40 = vector.load %arg7[%c0_21, %c0_22] : memref<1x128xf32, #tpu.memory_space<vmem>>, vector<1x128xf32>
    %c0_23 = arith.constant 0 : index
    %c0_24 = arith.constant 0 : index
    %41 = vector.load %arg8[%c0_23, %c0_24] : memref<1x128xf32, #tpu.memory_space<vmem>>, vector<1x128xf32>
    %cst_25 = arith.constant dense<0.000000e+00> : vector<128xf32>
    %42 = vector.multi_reduction <add>, %39, %cst_25 [0] : vector<8x128xf32> to vector<128xf32>
    %43 = vector.shape_cast %42 : vector<128xf32> to vector<1x128xf32>
    %cst_26 = arith.constant 1.250000e-01 : f32
    %44 = vector.broadcast %cst_26 : f32 to vector<1x128xf32>
    %45 = arith.mulf %43, %44 : vector<1x128xf32>
    %46 = vector.broadcast %45 : vector<1x128xf32> to vector<8x128xf32>
    %47 = arith.subf %39, %46 : vector<8x128xf32>
    %48 = arith.mulf %47, %47 : vector<8x128xf32>
    %cst_27 = arith.constant dense<0.000000e+00> : vector<128xf32>
    %49 = vector.multi_reduction <add>, %48, %cst_27 [0] : vector<8x128xf32> to vector<128xf32>
    %50 = vector.shape_cast %49 : vector<128xf32> to vector<1x128xf32>
    %cst_28 = arith.constant 1.250000e-01 : f32
    %51 = vector.broadcast %cst_28 : f32 to vector<1x128xf32>
    %52 = arith.mulf %50, %51 : vector<1x128xf32>
    %cst_29 = arith.constant 9.99999974E-6 : f32
    %53 = vector.broadcast %cst_29 : f32 to vector<1x128xf32>
    %54 = arith.addf %52, %53 : vector<1x128xf32>
    %55 = math.rsqrt %54 : vector<1x128xf32>
    %56 = arith.mulf %40, %55 : vector<1x128xf32>
    %57 = arith.mulf %45, %56 : vector<1x128xf32>
    %58 = arith.subf %41, %57 : vector<1x128xf32>
    %59 = vector.broadcast %56 : vector<1x128xf32> to vector<8x128xf32>
    %60 = arith.mulf %39, %59 : vector<8x128xf32>
    %61 = vector.broadcast %58 : vector<1x128xf32> to vector<8x128xf32>
    %62 = arith.addf %60, %61 : vector<8x128xf32>
    %63 = arith.truncf %62 : vector<8x128xf32> to vector<8x128xbf16>
    %c0_30 = arith.constant 0 : index
    %c0_31 = arith.constant 0 : index
    %64 = vector.load %arg9[%c0_30, %c0_31] : memref<128x128xbf16, #tpu.memory_space<vmem>>, vector<128x128xbf16>
    %cst_32 = arith.constant dense<0.000000e+00> : vector<8x128xf32>
    %65 = tpu.matmul %63, %64, %cst_32 {dimension_numbers = #tpu.dot_dimension_numbers<[1], [0], [0], [1], [0, 0, 1, 1], [], []>} : vector<8x128xbf16>, vector<128x128xbf16>, vector<8x128xf32> -> vector<8x128xf32>
    %c0_33 = arith.constant 0 : index
    %c0_34 = arith.constant 0 : index
    %66 = vector.load %arg10[%c0_33, %c0_34] : memref<1x128xf32, #tpu.memory_space<vmem>>, vector<1x128xf32>
    %67 = vector.broadcast %66 : vector<1x128xf32> to vector<8x128xf32>
    %68 = arith.addf %65, %67 : vector<8x128xf32>
    %c0_35 = arith.constant 0 : index
    %c0_36 = arith.constant 0 : index
    %69 = vector.load %arg11[%c0_35, %c0_36] : memref<8x128xf32, #tpu.memory_space<vmem>>, vector<8x128xf32>
    tpu.vector_store %arg11[%c0_35, %c0_36], %68 {strides = array<i32>} : memref<8x128xf32, #tpu.memory_space<vmem>>, vector<8x128xf32>,
    return
  }
}

</mosaic_0001>

<bundles_post_ra>
// kernel: binary_classification_forward.1
= control target key start
LH: loop header
LB: loop body
LE: loop exit
PB: predicated region body
PF: predicated region fallthrough
CT: control target
= control target key end

     0   :  { %16 = vsyncpa [#allocation3], 0  ;;  %s824_s0 = inlined_call_operand.hbm [shape: f32[8,16], index: 0, kind: input, shape index: {}]   ;;  %s825_s1 = inlined_call_operand.vmem [shape: bf16[16,128], index: 1, kind: input, shape index: {}]   ;;  %s826_s2 = inlined_call_operand.vmem [shape: f32[1,128], index: 2, kind: input, shape index: {}]   ;;  %s827_s3 = inlined_call_operand.vmem [shape: f32[1,128], index: 3, kind: input, shape index: {}]   ;;  %s828_s4 = inlined_call_operand.vmem [shape: f32[1,128], index: 4, kind: input, shape index: {}]   ;;  %s829_s5 = inlined_call_operand.hbm [shape: bf16[128,128], index: 5, kind: input, shape index: {}]   ;;  %s830_s6 = inlined_call_operand.hbm [shape: f32[1,128], index: 6, kind: input, shape index: {}]   ;;  %s831_s7 = inlined_call_operand.vmem [shape: f32[1,128], index: 7, kind: input, shape index: {}]   ;;  %s832_s8 = inlined_call_operand.vmem [shape: f32[1,128], index: 8, kind: input, shape index: {}]   ;;  %s833_s9 = inlined_call_operand.hbm [shape: bf16[128,128], index: 9, kind: input, shape index: {}]   ;;  %s834_s10 = inlined_call_operand.hbm [shape: f32[1,128], index: 10, kind: input, shape index: {}]   ;;  %s835_s11 = inlined_call_operand.vmem [shape: f32[8,128], index: 11, kind: output, shape index: {}]  }
   0x1   :  { %17 = vsyncpa [#allocation5], 0 }
   0x2   :  { %18 = vsyncpa [#allocation8], 0  ;;  %s693_s17 = smov [#allocation4]  }
   0x3   :  { %s42_s18 = sshll.u32 %s693_s17, 4  ;;  %s43_s18 = int_to_ptr.vmem [resolvable:$true] %s42_s18 }
   0x4   :  { %s595_s19 = scalar_lea.vmem %s43_s18, 1024  ;;  %p600_p1 = scmp.lt.s32.totalorder %s43_s18, %s43_s18 }
   0x5   :  { %p596_p0 = scmp.ne.s32.totalorder %s43_s18, %s595_s19  ;;  %p601_p2 = scmp.lt.s32.totalorder %s595_s19, %s595_s19 }
   0x7   :  { %p602_p3 = por %p601_p2, %p600_p1 }
   0x9   :  { %p603_p4 = pnand %p602_p3, %p596_p0 }
   0xb   :  { %606 = shalt.err (!%p603_p4)
}
   0xc   :  { %s694_s20 = smov 64   ;;  %s695_s21 = smov 4  }
   0xd   :  { %48 = dma.hbm_to_vmem [thread:$0]  %s829_s5, 1024, %s43_s18, [#allocation5], %s694_s20, %s694_s20, %s695_s21  }
   0xe   :  { %s696_s24 = smov [#allocation7]   ;;  %s697_s26 = smov [#allocation2]  }
   0xf   :  { %s68_s25 = sshll.u32 %s696_s24, 4  ;;  %s25_s27 = sshll.u32 %s697_s26, 4  ;;  %s69_s25 = int_to_ptr.vmem [resolvable:$true] %s68_s25  ;;  %s26_s27 = int_to_ptr.vmem [resolvable:$true] %s25_s27 }
  0x10   :  { %s615_s28 = scalar_lea.vmem %s69_s25, 1024  ;;  %p620_p6 = scmp.lt.s32.totalorder %s69_s25, %s69_s25 }
  0x11   :  { %p616_p5 = scmp.ne.s32.totalorder %s69_s25, %s615_s28  ;;  %p621_p7 = scmp.lt.s32.totalorder %s615_s28, %s615_s28 }
  0x13   :  { %p622_p8 = por %p621_p7, %p620_p6 }
  0x15   :  { %p623_p9 = pnand %p622_p8, %p616_p5 }
  0x17   :  { %626 = shalt.err (!%p623_p9)
}
  0x18   :  { %74 = dma.hbm_to_vmem [thread:$0]  %s833_s9, 1024, %s69_s25, [#allocation8], %s694_s20, %s694_s20, %s695_s21  }
  0x19   :  { %s635_s12 = scalar_lea.vmem %s26_s27, 128  ;;  %p640_p11 = scmp.lt.s32.totalorder %s26_s27, %s26_s27 }
  0x1a   :  { %p636_p10 = scmp.ne.s32.totalorder %s26_s27, %s635_s12  ;;  %p641_p12 = scmp.lt.s32.totalorder %s635_s12, %s635_s12 }
  0x1c   :  { %p642_p13 = por %p641_p12, %p640_p11 }
  0x1e   :  { %p643_p0 = pnand %p642_p13, %p636_p10 }
  0x20   :  { %646 = shalt.err (!%p643_p0)
}
  0x21   :  { %28 = dma.hbm_to_vmem [thread:$0]  %s824_s0, 128, %s26_s27, [#allocation3]  }
  0x22   :  { %s698_s14 = smov [#allocation6]   ;;  %s699_s16 = smov [#allocation9]  }
  0x23   :  { %s55_s15 = sshll.u32 %s698_s14, 4  ;;  %s81_s17 = sshll.u32 %s699_s16, 4  ;;  %s56_s15 = int_to_ptr.vmem [resolvable:$true] %s55_s15  ;;  %s82_s17 = int_to_ptr.vmem [resolvable:$true] %s81_s17 }
  0x24   :  { %s655_s18 = scalar_lea.vmem %s56_s15, 16  ;;  %s659_s9 = scalar_lea.vmem %s56_s15, 32 }
  0x25   :  { %p656_p1 = scmp.ne.s32.totalorder %s56_s15, %s655_s18  ;;  %p660_p2 = scmp.lt.s32.totalorder %s56_s15, %s56_s15 }
  0x26   :  { %p661_p3 = scmp.lt.s32.totalorder %s659_s9, %s655_s18 }
  0x28   :  { %p662_p4 = por %p661_p3, %p660_p2 }
  0x2a   :  { %p663_p5 = pnand %p662_p4, %p656_p1 }
  0x2c   :  { %666 = shalt.err (!%p663_p5)
}
  0x2d   :  { %58 = dma.hbm_to_vmem [thread:$0]  %s830_s6, 16, %s56_s15, [#allocation5]  }
  0x2e   :  { %s675_s21 = scalar_lea.vmem %s82_s17, 16  ;;  %s679_s0 = scalar_lea.vmem %s82_s17, 32 }
  0x2f   :  { %p676_p6 = scmp.ne.s32.totalorder %s82_s17, %s675_s21  ;;  %p680_p7 = scmp.lt.s32.totalorder %s82_s17, %s82_s17 }
  0x30   :  { %p681_p8 = scmp.lt.s32.totalorder %s679_s0, %s675_s21 }
  0x32   :  { %p682_p9 = por %p681_p8, %p680_p7 }
  0x34   :  { %p683_p10 = pnand %p682_p9, %p676_p6 }
  0x36   :  { %686 = shalt.err (!%p683_p10)
}
  0x37   :  { %84 = dma.hbm_to_vmem [thread:$0]  %s834_s10, 16, %s82_s17, [#allocation8]  }
  0x38   :  { %687 = dma.done.wait [#allocation3], 128  }
  0x39   :  { %688 = vsyncadd [#allocation3], 4294967168 }
  0x3a   :  { %689 = dma.done.wait [#allocation5], 1040  }
  0x3b   :  { %690 = vsyncadd [#allocation5], 4294966256 }
  0x3c   :  { %691 = dma.done.wait [#allocation8], 1040  }
  0x3d   :  { %692 = vsyncadd [#allocation8], 4294966256  ;;  %v700_v0 = vmov 0.0   ;;  %vm701_vm0 = vmmov 0   ;;  %v566_v1 = vld [vmem:[%s825_s1] sm:$0xff]   ;;  %vm118_vm1 = vcmask 130048   ;;  %v187_v36 = vlaneseq }
  0x3e   :  { %511 = vmatprep.subr.bf16.mxu0 %v700_v0  ;;  %513 = vmatprep.mubr.msk.bf16.mxu0 %vm701_vm0, %v700_v0  ;;  %v101_v2 = vld [vmem:[#allocation2] sm:$0xff]  ;;  %v568_v5 = vld [vmem:[#allocation4 + $0x30] sm:$0xff]   ;;  %v569_v6 = vld [vmem:[#allocation4 + $0x28] sm:$0xff]  }
  0x3f   :  { %517 = vmatprep.subr.bf16.mxu1 %v700_v0  ;;  %533 = vmatprep.mubr.msk.bf16.mxu1 %vm701_vm0, %v700_v0  ;;  %v102_v3 = vpack.c.bf16 %v101_v2, %v101_v2  ;;  %v567_v4 = vld [vmem:[#allocation4 + $0x38] sm:$0xff]   ;;  %v570_v7 = vld [vmem:[#allocation4 + $0x20] sm:$0xff]   ;;  %v572_v9 = vld [vmem:[#allocation4 + $0x10] sm:$0xff]   ;;  %v188_v37 = vshrl.u32 %v187_v36, 7 }
  0x40   :  { %512 = vmatpush3.bf16.msra.mxu0 %v566_v1  ;;  %518 = vmatpush3.bf16.msra.mxu1 %v567_v4  ;;  %v571_v8 = vld [vmem:[#allocation4 + $0x18] sm:$0xff]   ;;  %v573_v10 = vld [vmem:[#allocation4 + $0x8] sm:$0xff]   ;;  %v574_v11 = vld [vmem:[#allocation4] sm:$0xff]  }
  0x41   :  { %537 = vmatprep.subr.bf16.mxu0 %v700_v0  ;;  %519 = vmatprep.subr.bf16.mxu1 %v700_v0  ;;  %v470_v12 = vld [vmem:[%s826_s2] ss:$0 sm:$0xff]  ;;  %v799_v39 = vsub.s32 0, %v188_v37  ;;  %v575_v50 = vld [vmem:[#allocation7 + $0x38] sm:$0xff]   ;;  %v577_v52 = vld [vmem:[#allocation7 + $0x28] sm:$0xff]  }
  0x42   :  { %v163_v38 = vld [vmem:[%s827_s3] sm:$0x1]  ;;  %v578_v53 = vld [vmem:[#allocation7 + $0x20] sm:$0xff]   ;;  %v579_v54 = vld [vmem:[#allocation7 + $0x18] sm:$0xff]  }
  0x43   :  { %514 = vmatmul.mubr.msk.bf16.vlgmr.msra.gmra.mxu0 %vm118_vm1, %v102_v3  ;;  %v164_v42 = vld [vmem:[%s828_s4] sm:$0x1]  ;;  %v581_v56 = vld [vmem:[#allocation7 + $0x8] sm:$0xff]   ;;  %v582_v57 = vld [vmem:[#allocation7] sm:$0xff]  }
  0x44   :  { %553 = vmatprep.mubr.msk.bf16.mxu0 %vm701_vm0, %v700_v0  ;;  %520 = vmatpush3.bf16.msra.mxu1 %v568_v5  ;;  %v576_v51 = vld [vmem:[#allocation7 + $0x30] sm:$0xff]   ;;  %v473_v58 = vld [vmem:[#allocation6] ss:$0 sm:$0xff] }
  0x45   :  { %521 = vmatprep.subr.bf16.mxu1 %v700_v0  ;;  %538 = vmatpush3.bf16.msra.mxu0 %v575_v50  ;;  %v580_v55 = vld [vmem:[#allocation7 + $0x10] sm:$0xff]  }
  0x46   :  { %539 = vmatprep.subr.bf16.mxu0 %v700_v0 }
  0x48   :  { %522 = vmatpush3.bf16.msra.mxu1 %v569_v6 }
  0x49   :  { %523 = vmatprep.subr.bf16.mxu1 %v700_v0  ;;  %540 = vmatpush3.bf16.msra.mxu0 %v576_v51 }
  0x4a   :  { %541 = vmatprep.subr.bf16.mxu0 %v700_v0 }
  0x4c   :  { %524 = vmatpush3.bf16.msra.mxu1 %v570_v7 }
  0x4d   :  { %525 = vmatprep.subr.bf16.mxu1 %v700_v0  ;;  %542 = vmatpush3.bf16.msra.mxu0 %v577_v52 }
  0x4e   :  { %543 = vmatprep.subr.bf16.mxu0 %v700_v0 }
  0x50   :  { %526 = vmatpush3.bf16.msra.mxu1 %v571_v8 }
  0x51   :  { %527 = vmatprep.subr.bf16.mxu1 %v700_v0  ;;  %544 = vmatpush3.bf16.msra.mxu0 %v578_v53 }
  0x52   :  { %545 = vmatprep.subr.bf16.mxu0 %v700_v0 }
  0x54   :  { %528 = vmatpush3.bf16.msra.mxu1 %v572_v9 }
  0x55   :  { %529 = vmatprep.subr.bf16.mxu1 %v700_v0  ;;  %546 = vmatpush3.bf16.msra.mxu0 %v579_v54 }
  0x56   :  { %547 = vmatprep.subr.bf16.mxu0 %v700_v0 }
  0x58   :  { %530 = vmatpush3.bf16.msra.mxu1 %v573_v10 }
  0x59   :  { %531 = vmatprep.subr.bf16.mxu1 %v700_v0  ;;  %548 = vmatpush3.bf16.msra.mxu0 %v580_v55 }
  0x5a   :  { %549 = vmatprep.subr.bf16.mxu0 %v700_v0 }
  0x5c   :  { %532 = vmatpush3.bf16.msra.mxu1 %v574_v11 }
  0x5d   :  { %550 = vmatpush3.bf16.msra.mxu0 %v581_v56 }
  0x5e   :  { %551 = vmatprep.subr.bf16.mxu0 %v700_v0 }
  0x61   :  { %552 = vmatpush3.bf16.msra.mxu0 %v582_v57 }
 0x103   :  { %v156_v13 = vpop.f32.mrf.mxu0 }
 0x104   :  { %v157_v14 = vadd.f32 %v470_v12, %v156_v13 }
 0x105   :  { %v515_v15 = vpop.f32.mrf.mxu0 }
 0x106   :  { %v162_v16 = vmax.f32 %v157_v14, 0.0 }
 0x107   :  { %v159_v17 = vpop.f32.mrf.mxu0 }
 0x108   :  { %v165_v18 = vrot.slane %v162_v16, 4 }
 0x109   :  { %v516_v19 = vpop.f32.mrf.mxu0 }
 0x10a   :  { %v166_v20 = vadd.f32 %v165_v18, %v162_v16  ;;  %v313_v18 = vld [vmem:[%s831_s7] sm:$0x1] }
 0x10c   :  { %v167_v21 = vrot.slane %v166_v20, 2 }
 0x10e   :  { %v168_v22 = vadd.f32 %v167_v21, %v166_v20  ;;  %v314_v21 = vld [vmem:[%s832_s8] sm:$0x1] }
 0x110   :  { %v169_v23 = vrot.slane %v168_v22, 1 }
 0x112   :  { %v170_v24 = vadd.f32 %v169_v23, %v168_v22 }
 0x114   :  { %v171_v25 = vmul.f32 0.125, %v170_v24 }
 0x116   :  { %v172_v26 = vsub.f32 %v162_v16, %v171_v25 }
 0x118   :  { %v173_v27 = vmul.f32 %v172_v26, %v172_v26 }
 0x11a   :  { %v174_v28 = vrot.slane %v173_v27, 4 }
 0x11c   :  { %v175_v29 = vadd.f32 %v174_v28, %v173_v27 }
 0x11e   :  { %v176_v30 = vrot.slane %v175_v29, 2 }
 0x120   :  { %v177_v31 = vadd.f32 %v176_v30, %v175_v29  ;;  %v482_v29 = vld [vmem:[#allocation9] ss:$0 sm:$0xff] }
 0x122   :  { %v178_v32 = vrot.slane %v177_v31, 1 }
 0x124   :  { %v179_v33 = vadd.f32 %v178_v32, %v177_v31 }
 0x126   :  { %v180_v34 = vmul.f32 0.125, %v179_v33 }
 0x128   :  { %v181_v35 = vadd.f32 1e-05, %v180_v34 }
 0x12a   :  { %583 = vrsqrt.f32 %v181_v35 }
 0x137   :  { %v584_v40 = vpop.eup %583 }
 0x138   :  { %v183_v41 = vmul.f32 %v584_v40, %v163_v38 }
 0x13a   :  { %v184_v43 = vmul.f32 %v183_v41, %v171_v25  ;;  %v190_v44 = vrot.slane %v183_v41, %v799_v39 }
 0x13c   :  { %v185_v45 = vsub.f32 %v164_v42, %v184_v43  ;;  %v192_v46 = vmul.f32 %v190_v44, %v162_v16 }
 0x13e   :  { %v197_v47 = vrot.slane %v185_v45, %v799_v39 }
 0x140   :  { %v199_v48 = vadd.f32 %v197_v47, %v192_v46 }
 0x142   :  { %v200_v49 = vpack.c.bf16 %v199_v48, %v199_v48 }
 0x144   :  { %534 = vmatmul.mubr.bf16.vlgmr.msra.gmra.mxu1 %v200_v49 }
 0x204   :  { %v306_v59 = vpop.f32.mrf.mxu1 }
 0x205   :  { %v307_v60 = vadd.f32 %v473_v58, %v306_v59 }
 0x206   :  { %v535_v61 = vpop.f32.mrf.mxu1 }
 0x207   :  { %v312_v62 = vmax.f32 %v307_v60, 0.0 }
 0x208   :  { %v309_v63 = vpop.f32.mrf.mxu1 }
 0x209   :  { %v315_v1 = vrot.slane %v312_v62, 4 }
 0x20a   :  { %v536_v2 = vpop.f32.mrf.mxu1 }
 0x20b   :  { %v316_v3 = vadd.f32 %v315_v1, %v312_v62 }
 0x20d   :  { %v317_v4 = vrot.slane %v316_v3, 2 }
 0x20f   :  { %v318_v5 = vadd.f32 %v317_v4, %v316_v3 }
 0x211   :  { %v319_v6 = vrot.slane %v318_v5, 1 }
 0x213   :  { %v320_v7 = vadd.f32 %v319_v6, %v318_v5 }
 0x215   :  { %v321_v8 = vmul.f32 0.125, %v320_v7 }
 0x217   :  { %v322_v9 = vsub.f32 %v312_v62, %v321_v8 }
 0x219   :  { %v323_v10 = vmul.f32 %v322_v9, %v322_v9 }
 0x21b   :  { %v324_v11 = vrot.slane %v323_v10, 4 }
 0x21d   :  { %v325_v12 = vadd.f32 %v324_v11, %v323_v10 }
 0x21f   :  { %v326_v0 = vrot.slane %v325_v12, 2 }
 0x221   :  { %v327_v13 = vadd.f32 %v326_v0, %v325_v12 }
 0x223   :  { %v328_v14 = vrot.slane %v327_v13, 1 }
 0x225   :  { %v329_v15 = vadd.f32 %v328_v14, %v327_v13 }
 0x227   :  { %v330_v16 = vmul.f32 0.125, %v329_v15 }
 0x229   :  { %v331_v17 = vadd.f32 1e-05, %v330_v16 }
 0x22b   :  { %585 = vrsqrt.f32 %v331_v17 }
 0x238   :  { %v586_v19 = vpop.eup %585 }
 0x239   :  { %v333_v20 = vmul.f32 %v586_v19, %v313_v18 }
 0x23b   :  { %v334_v22 = vmul.f32 %v333_v20, %v321_v8  ;;  %v340_v23 = vrot.slane %v333_v20, %v799_v39 }
 0x23d   :  { %v335_v24 = vsub.f32 %v314_v21, %v334_v22  ;;  %v342_v25 = vmul.f32 %v340_v23, %v312_v62 }
 0x23f   :  { %v347_v26 = vrot.slane %v335_v24, %v799_v39 }
 0x241   :  { %v349_v27 = vadd.f32 %v347_v26, %v342_v25 }
 0x243   :  { %v350_v28 = vpack.c.bf16 %v349_v27, %v349_v27 }
 0x245   :  { %554 = vmatmul.mubr.bf16.vlgmr.msra.gmra.mxu0 %v350_v28 }
 0x305   :  { %v456_v30 = vpop.f32.mrf.mxu0 }
 0x306   :  { %v457_v31 = vadd.f32 %v482_v29, %v456_v30 }
 0x307   :  { %v555_v32 = vpop.f32.mrf.mxu0 }
 0x308   :  { %462 = vst [vmem:[%s835_s11] sm:$0xff] %v457_v31 }
 0x309   :  { %v459_v33 = vpop.f32.mrf.mxu0 }
 0x30b   :  { %v556_v34 = vpop.f32.mrf.mxu0 }
 0x30c   :  { %467 = vsyncpa [#allocation3], 1 }
 0x30d   :  { %468 = vsyncpa [#allocation5], 1 }
 0x30e   :  { %469 = vsyncpa [#allocation8], 1 }

</bundles_post_ra>
